<compile_context>
chip_gen: v5e
topology: v5e:2x2
jax: 0.10.0
libtpu: 0.0.40
codegen_flags: <defaults>
</compile_context>

<pallas_src>
import functools

import jax
import jax.numpy as jnp
from jax.experimental import pallas as pl
from jax.experimental.pallas import tpu as pltpu


def _conv_block_kernel(w_ref, shift_ref, x_ref, o_ref, *, kh, kw, wq):
    # w_ref:     (KH*KW, OC, C) f32  per-tap weights, BN scale pre-folded along OC
    # shift_ref: (OC, 1)        f32  folded BN shift = beta - mean * scale
    # x_ref:     (1, C, L)      f32  zero-padded input for this batch, spatial dims flattened
    # o_ref:     (1, OC, M_OUT) f32  lane-dense output slab in the padded-input geometry
    _, oc, m_out = o_ref.shape
    xv = x_ref[0]                                            # (C, L)
    acc = jnp.zeros((oc, m_out), dtype=jnp.float32)
    # Statically unrolled shift-and-accumulate over the KH*KW taps (in-kernel "im2col").
    for i in range(kh):
        for j in range(kw):
            off = i * wq + j
            xs = xv[:, off:off + m_out]                      # (C, M_OUT) static lane shift
            acc = acc + jnp.dot(w_ref[i * kw + j], xs,
                                preferred_element_type=jnp.float32)
    y = acc + shift_ref[...]                                 # BN shift (scale already folded)
    o_ref[0] = jnp.maximum(y, 0.1 * y).astype(o_ref.dtype)   # LeakyReLU(0.1)


def _round_up(x, m):
    return ((x + m - 1) // m) * m


@functools.partial(jax.jit, static_argnames=("stride", "padding"))
def conv_block_forward(x, weight, gamma, beta, running_mean, running_var,
                       stride=1, padding=0, eps=1e-5):
    """x: (N, C, H, W) NCHW; weight: (OC, C, KH, KW) (PyTorch OIHW)."""
    n, c, h, w = x.shape
    oc, _, kh, kw = weight.shape

    wq = w + 2 * padding
    oh = (h + 2 * padding - kh) // stride + 1
    ow = (w + 2 * padding - kw) // stride + 1

    # Output is computed in the padded-input geometry: valid output (oh_, ow_) lives at flat
    # position oh_*stride*wq + ow_*stride. Round the slab width up to a multiple of 128 so
    # stores stay lane-dense; tail positions are garbage and are sliced off below.
    rows_needed = (oh - 1) * stride + 1
    m_valid = rows_needed * wq
    m_out = _round_up(m_valid, 128)

    # Pad the input once: conv padding + enough extra zero rows that every tap-shifted slice
    # of length m_out stays in bounds. Single small pad pass — no im2col materialization.
    need = m_out + (kh - 1) * wq + (kw - 1)
    hq = max(h + 2 * padding, -(-need // wq))
    xp = jnp.pad(x, ((0, 0), (0, 0), (padding, hq - h - padding), (padding, padding)))
    xf = xp.reshape(n, c, hq * wq)
    l_flat = hq * wq

    # Fold BN (eval mode) into a per-OC scale/shift; fold the scale into the weights.
    scale = gamma / jnp.sqrt(running_var + eps)                         # (OC,)
    shift = (beta - running_mean * scale).reshape(oc, 1).astype(jnp.float32)
    w_taps = (weight * scale[:, None, None, None]).astype(jnp.float32)
    w_taps = w_taps.transpose(2, 3, 0, 1).reshape(kh * kw, oc, c)       # (KH*KW, OC, C)

    kernel = functools.partial(_conv_block_kernel, kh=kh, kw=kw, wq=wq)
    flops = 2 * n * oc * c * kh * kw * m_out
    bytes_accessed = (xf.size + w_taps.size + shift.size + n * oc * m_out) * 4

    out = pl.pallas_call(
        kernel,
        out_shape=jax.ShapeDtypeStruct((n, oc, m_out), x.dtype),
        grid_spec=pltpu.PrefetchScalarGridSpec(
            num_scalar_prefetch=0,
            grid=(n,),                                                  # one slab per batch
            in_specs=[
                pl.BlockSpec((kh * kw, oc, c), lambda b: (0, 0, 0)),    # weights (resident)
                pl.BlockSpec((oc, 1), lambda b: (0, 0)),                # BN shift (resident)
                pl.BlockSpec((1, c, l_flat), lambda b: (b, 0, 0)),      # this batch's input
            ],
            out_specs=pl.BlockSpec((1, oc, m_out), lambda b: (b, 0, 0)),
        ),
        compiler_params=pltpu.CompilerParams(
            dimension_semantics=("parallel",)),
        cost_estimate=pl.CostEstimate(flops=flops, transcendentals=0,
                                      bytes_accessed=bytes_accessed),
    )(w_taps, shift, xf)

    # Tiny contiguous fix-up: drop padded-geometry tail/columns -> NCHW (no transpose pass).
    out = out[:, :, :m_valid].reshape(n, oc, rows_needed, wq)
    out = out[:, :, ::stride, ::stride][:, :, :, :ow]                   # (N, OC, OH, OW)
    return out


def _reference(x, weight, gamma, beta, running_mean, running_var,
               stride, padding, eps=1e-5):
    y = jax.lax.conv_general_dilated(
        x, weight,
        window_strides=(stride, stride),
        padding=[(padding, padding), (padding, padding)],
        dimension_numbers=("NCHW", "OIHW", "NCHW"))
    scale = (gamma / jnp.sqrt(running_var + eps)).reshape(1, -1, 1, 1)
    shift = (beta - running_mean * gamma / jnp.sqrt(running_var + eps)).reshape(1, -1, 1, 1)
    y = y * scale + shift
    return jnp.where(y > 0, y, 0.1 * y)


if __name__ == "__main__":
    # ConvBlock(in_channels=4, out_channels=8, kernel_size=3, stride=1, padding=1)
    N, C, H, W = 2, 4, 16, 16
    OC, KH, KW = 8, 3, 3
    stride, padding = 1, 1

    key = jax.random.PRNGKey(0)
    kx, kw_, kg, kb, km, kv = jax.random.split(key, 6)

    x = jax.random.normal(kx, (N, C, H, W), dtype=jnp.float32)
    weight = jax.random.normal(kw_, (OC, C, KH, KW), dtype=jnp.float32) * 0.1
    gamma = 1.0 + 0.1 * jax.random.normal(kg, (OC,), dtype=jnp.float32)
    beta = 0.1 * jax.random.normal(kb, (OC,), dtype=jnp.float32)
    running_mean = 0.1 * jax.random.normal(km, (OC,), dtype=jnp.float32)
    running_var = jnp.abs(1.0 + 0.1 * jax.random.normal(kv, (OC,), dtype=jnp.float32))

    out = conv_block_forward(x, weight, gamma, beta, running_mean, running_var,
                             stride=stride, padding=padding)
    out = jax.block_until_ready(out)

    ref = _reference(x, weight, gamma, beta, running_mean, running_var,
                     stride, padding)
    assert out.shape == (N, OC, H, W), out.shape
    max_err = float(jnp.max(jnp.abs(out - ref)))
    # Full f32 path now (no bf16 cast of the GEMM operands), so the tolerance is tight again.
    assert jnp.allclose(out, ref, atol=1e-3, rtol=1e-3), max_err

    print("KERNEL_OK")
</pallas_src>

<mosaic_0001>
module attributes {stable_mosaic.version = 11 : i64} {
  func.func @_conv_block_kernel(%arg0: i32, %arg1: memref<9x8x4xf32, #tpu.memory_space<vmem>>, %arg2: memref<8x1xf32, #tpu.memory_space<vmem>>, %arg3: memref<1x4x432xf32, #tpu.memory_space<vmem>>, %arg4: memref<1x8x384xf32, #tpu.memory_space<vmem>>) attributes {dimension_semantics = [#tpu.dimension_semantics<parallel>], iteration_bounds = array<i64: 2>, scalar_prefetch = 0 : i64, scratch_operands = 0 : i64, tpu.core_type = #tpu.core_type<tc>, window_params = [{pipeline_mode = #tpu.pipeline_mode<synchronous>, transform_indices = @transform_0, window_bounds = array<i64: 9, 8, 4>}, {pipeline_mode = #tpu.pipeline_mode<synchronous>, transform_indices = @transform_1, window_bounds = array<i64: 8, 1>}, {transform_indices = @transform_2, window_bounds = array<i64: 1, 4, 432>}, {transform_indices = @transform_3, window_bounds = array<i64: 1, 8, 384>}]} {
    %c0 = arith.constant 0 : index
    %c0_0 = arith.constant 0 : index
    %c0_1 = arith.constant 0 : index
    %0 = vector.load %arg3[%c0, %c0_0, %c0_1] : memref<1x4x432xf32, #tpu.memory_space<vmem>>, vector<1x4x432xf32>
    %1 = vector.shape_cast %0 : vector<1x4x432xf32> to vector<4x432xf32>
    %cst = arith.constant 0.000000e+00 : f32
    %2 = vector.broadcast %cst : f32 to vector<8x384xf32>
    %3 = vector.extract_strided_slice %1 {offsets = [0, 0], sizes = [4, 384], strides = [1, 1]} : vector<4x432xf32> to vector<4x384xf32>
    %c0_2 = arith.constant 0 : index
    %c0_3 = arith.constant 0 : index
    %c0_4 = arith.constant 0 : index
    %4 = vector.load %arg1[%c0_2, %c0_3, %c0_4] : memref<9x8x4xf32, #tpu.memory_space<vmem>>, vector<1x8x4xf32>
    %5 = vector.shape_cast %4 : vector<1x8x4xf32> to vector<8x4xf32>
    %cst_5 = arith.constant dense<0.000000e+00> : vector<8x384xf32>
    %6 = tpu.matmul %5, %3, %cst_5 {dimension_numbers = #tpu.dot_dimension_numbers<[1], [0], [0], [1], [0, 0, 1, 1], [], []>} : vector<8x4xf32>, vector<4x384xf32>, vector<8x384xf32> -> vector<8x384xf32>
    %7 = arith.addf %2, %6 : vector<8x384xf32>
    %8 = vector.extract_strided_slice %1 {offsets = [0, 1], sizes = [4, 384], strides = [1, 1]} : vector<4x432xf32> to vector<4x384xf32>
    %c1 = arith.constant 1 : index
    %c0_6 = arith.constant 0 : index
    %c0_7 = arith.constant 0 : index
    %9 = vector.load %arg1[%c1, %c0_6, %c0_7] : memref<9x8x4xf32, #tpu.memory_space<vmem>>, vector<1x8x4xf32>
    %10 = vector.shape_cast %9 : vector<1x8x4xf32> to vector<8x4xf32>
    %cst_8 = arith.constant dense<0.000000e+00> : vector<8x384xf32>
    %11 = tpu.matmul %10, %8, %cst_8 {dimension_numbers = #tpu.dot_dimension_numbers<[1], [0], [0], [1], [0, 0, 1, 1], [], []>} : vector<8x4xf32>, vector<4x384xf32>, vector<8x384xf32> -> vector<8x384xf32>
    %12 = arith.addf %7, %11 : vector<8x384xf32>
    %13 = vector.extract_strided_slice %1 {offsets = [0, 2], sizes = [4, 384], strides = [1, 1]} : vector<4x432xf32> to vector<4x384xf32>
    %c2 = arith.constant 2 : index
    %c0_9 = arith.constant 0 : index
    %c0_10 = arith.constant 0 : index
    %14 = vector.load %arg1[%c2, %c0_9, %c0_10] : memref<9x8x4xf32, #tpu.memory_space<vmem>>, vector<1x8x4xf32>
    %15 = vector.shape_cast %14 : vector<1x8x4xf32> to vector<8x4xf32>
    %cst_11 = arith.constant dense<0.000000e+00> : vector<8x384xf32>
    %16 = tpu.matmul %15, %13, %cst_11 {dimension_numbers = #tpu.dot_dimension_numbers<[1], [0], [0], [1], [0, 0, 1, 1], [], []>} : vector<8x4xf32>, vector<4x384xf32>, vector<8x384xf32> -> vector<8x384xf32>
    %17 = arith.addf %12, %16 : vector<8x384xf32>
    %18 = vector.extract_strided_slice %1 {offsets = [0, 18], sizes = [4, 384], strides = [1, 1]} : vector<4x432xf32> to vector<4x384xf32>
    %c3 = arith.constant 3 : index
    %c0_12 = arith.constant 0 : index
    %c0_13 = arith.constant 0 : index
    %19 = vector.load %arg1[%c3, %c0_12, %c0_13] : memref<9x8x4xf32, #tpu.memory_space<vmem>>, vector<1x8x4xf32>
    %20 = vector.shape_cast %19 : vector<1x8x4xf32> to vector<8x4xf32>
    %cst_14 = arith.constant dense<0.000000e+00> : vector<8x384xf32>
    %21 = tpu.matmul %20, %18, %cst_14 {dimension_numbers = #tpu.dot_dimension_numbers<[1], [0], [0], [1], [0, 0, 1, 1], [], []>} : vector<8x4xf32>, vector<4x384xf32>, vector<8x384xf32> -> vector<8x384xf32>
    %22 = arith.addf %17, %21 : vector<8x384xf32>
    %23 = vector.extract_strided_slice %1 {offsets = [0, 19], sizes = [4, 384], strides = [1, 1]} : vector<4x432xf32> to vector<4x384xf32>
    %c4 = arith.constant 4 : index
    %c0_15 = arith.constant 0 : index
    %c0_16 = arith.constant 0 : index
    %24 = vector.load %arg1[%c4, %c0_15, %c0_16] : memref<9x8x4xf32, #tpu.memory_space<vmem>>, vector<1x8x4xf32>
    %25 = vector.shape_cast %24 : vector<1x8x4xf32> to vector<8x4xf32>
    %cst_17 = arith.constant dense<0.000000e+00> : vector<8x384xf32>
    %26 = tpu.matmul %25, %23, %cst_17 {dimension_numbers = #tpu.dot_dimension_numbers<[1], [0], [0], [1], [0, 0, 1, 1], [], []>} : vector<8x4xf32>, vector<4x384xf32>, vector<8x384xf32> -> vector<8x384xf32>
    %27 = arith.addf %22, %26 : vector<8x384xf32>
    %28 = vector.extract_strided_slice %1 {offsets = [0, 20], sizes = [4, 384], strides = [1, 1]} : vector<4x432xf32> to vector<4x384xf32>
    %c5 = arith.constant 5 : index
    %c0_18 = arith.constant 0 : index
    %c0_19 = arith.constant 0 : index
    %29 = vector.load %arg1[%c5, %c0_18, %c0_19] : memref<9x8x4xf32, #tpu.memory_space<vmem>>, vector<1x8x4xf32>
    %30 = vector.shape_cast %29 : vector<1x8x4xf32> to vector<8x4xf32>
    %cst_20 = arith.constant dense<0.000000e+00> : vector<8x384xf32>
    %31 = tpu.matmul %30, %28, %cst_20 {dimension_numbers = #tpu.dot_dimension_numbers<[1], [0], [0], [1], [0, 0, 1, 1], [], []>} : vector<8x4xf32>, vector<4x384xf32>, vector<8x384xf32> -> vector<8x384xf32>
    %32 = arith.addf %27, %31 : vector<8x384xf32>
    %33 = vector.extract_strided_slice %1 {offsets = [0, 36], sizes = [4, 384], strides = [1, 1]} : vector<4x432xf32> to vector<4x384xf32>
    %c6 = arith.constant 6 : index
    %c0_21 = arith.constant 0 : index
    %c0_22 = arith.constant 0 : index
    %34 = vector.load %arg1[%c6, %c0_21, %c0_22] : memref<9x8x4xf32, #tpu.memory_space<vmem>>, vector<1x8x4xf32>
    %35 = vector.shape_cast %34 : vector<1x8x4xf32> to vector<8x4xf32>
    %cst_23 = arith.constant dense<0.000000e+00> : vector<8x384xf32>
    %36 = tpu.matmul %35, %33, %cst_23 {dimension_numbers = #tpu.dot_dimension_numbers<[1], [0], [0], [1], [0, 0, 1, 1], [], []>} : vector<8x4xf32>, vector<4x384xf32>, vector<8x384xf32> -> vector<8x384xf32>
    %37 = arith.addf %32, %36 : vector<8x384xf32>
    %38 = vector.extract_strided_slice %1 {offsets = [0, 37], sizes = [4, 384], strides = [1, 1]} : vector<4x432xf32> to vector<4x384xf32>
    %c7 = arith.constant 7 : index
    %c0_24 = arith.constant 0 : index
    %c0_25 = arith.constant 0 : index
    %39 = vector.load %arg1[%c7, %c0_24, %c0_25] : memref<9x8x4xf32, #tpu.memory_space<vmem>>, vector<1x8x4xf32>
    %40 = vector.shape_cast %39 : vector<1x8x4xf32> to vector<8x4xf32>
    %cst_26 = arith.constant dense<0.000000e+00> : vector<8x384xf32>
    %41 = tpu.matmul %40, %38, %cst_26 {dimension_numbers = #tpu.dot_dimension_numbers<[1], [0], [0], [1], [0, 0, 1, 1], [], []>} : vector<8x4xf32>, vector<4x384xf32>, vector<8x384xf32> -> vector<8x384xf32>
    %42 = arith.addf %37, %41 : vector<8x384xf32>
    %43 = vector.extract_strided_slice %1 {offsets = [0, 38], sizes = [4, 384], strides = [1, 1]} : vector<4x432xf32> to vector<4x384xf32>
    %c8 = arith.constant 8 : index
    %c0_27 = arith.constant 0 : index
    %c0_28 = arith.constant 0 : index
    %44 = vector.load %arg1[%c8, %c0_27, %c0_28] : memref<9x8x4xf32, #tpu.memory_space<vmem>>, vector<1x8x4xf32>
    %45 = vector.shape_cast %44 : vector<1x8x4xf32> to vector<8x4xf32>
    %cst_29 = arith.constant dense<0.000000e+00> : vector<8x384xf32>
    %46 = tpu.matmul %45, %43, %cst_29 {dimension_numbers = #tpu.dot_dimension_numbers<[1], [0], [0], [1], [0, 0, 1, 1], [], []>} : vector<8x4xf32>, vector<4x384xf32>, vector<8x384xf32> -> vector<8x384xf32>
    %47 = arith.addf %42, %46 : vector<8x384xf32>
    %c0_30 = arith.constant 0 : index
    %c0_31 = arith.constant 0 : index
    %48 = vector.load %arg2[%c0_30, %c0_31] : memref<8x1xf32, #tpu.memory_space<vmem>>, vector<8x1xf32>
    %49 = vector.broadcast %48 : vector<8x1xf32> to vector<8x384xf32>
    %50 = arith.addf %47, %49 : vector<8x384xf32>
    %cst_32 = arith.constant 1.000000e-01 : f32
    %51 = vector.broadcast %cst_32 : f32 to vector<8x384xf32>
    %52 = arith.mulf %51, %50 : vector<8x384xf32>
    %53 = arith.maximumf %50, %52 : vector<8x384xf32>
    %c0_33 = arith.constant 0 : index
    %c0_34 = arith.constant 0 : index
    %c0_35 = arith.constant 0 : index
    %54 = vector.load %arg4[%c0_33, %c0_34, %c0_35] : memref<1x8x384xf32, #tpu.memory_space<vmem>>, vector<1x8x384xf32>
    %55 = vector.shape_cast %54 : vector<1x8x384xf32> to vector<8x384xf32>
    %56 = vector.shape_cast %53 : vector<8x384xf32> to vector<1x8x384xf32>
    tpu.vector_store %arg4[%c0_33, %c0_34, %c0_35], %56 {strides = array<i32>} : memref<1x8x384xf32, #tpu.memory_space<vmem>>, vector<1x8x384xf32>,
    return
  }
  func.func @transform_0(%arg0: i32) -> (i32, i32, i32) {
    %c0_i32 = arith.constant 0 : i32
    %c0_i32_0 = arith.constant 0 : i32
    %c0_i32_1 = arith.constant 0 : i32
    %c0_i32_2 = arith.constant 0 : i32
    return %c0_i32, %c0_i32_0, %c0_i32_1 : i32, i32, i32
  }
  func.func @transform_1(%arg0: i32) -> (i32, i32) {
    %c0_i32 = arith.constant 0 : i32
    %c0_i32_0 = arith.constant 0 : i32
    %c0_i32_1 = arith.constant 0 : i32
    return %c0_i32, %c0_i32_0 : i32, i32
  }
  func.func @transform_2(%arg0: i32) -> (i32, i32, i32) {
    %c0_i32 = arith.constant 0 : i32
    %c0_i32_0 = arith.constant 0 : i32
    %c0_i32_1 = arith.constant 0 : i32
    return %arg0, %c0_i32, %c0_i32_0 : i32, i32, i32
  }
  func.func @transform_3(%arg0: i32) -> (i32, i32, i32) {
    %c0_i32 = arith.constant 0 : i32
    %c0_i32_0 = arith.constant 0 : i32
    %c0_i32_1 = arith.constant 0 : i32
    return %arg0, %c0_i32, %c0_i32_0 : i32, i32, i32
  }
}

</mosaic_0001>

<bundles_post_ra>
// kernel: conv_block_forward.1
= control target key start
LH: loop header
LB: loop body
LE: loop exit
PB: predicated region body
PF: predicated region fallthrough
CT: control target
= control target key end

     0   :  { %s1197_s12 = smov 0   ;;  %s1348_s0 = inlined_call_operand.vmem [shape: f32[9,8,4], index: 0, kind: input, shape index: {}]   ;;  %s1349_s1 = inlined_call_operand.vmem [shape: f32[8,1], index: 1, kind: input, shape index: {}]   ;;  %s1350_s2 = inlined_call_operand.vmem [shape: f32[2,4,432], index: 2, kind: input, shape index: {}]   ;;  %s1351_s3 = inlined_call_operand.vmem [shape: f32[2,8,384], index: 3, kind: output, shape index: {}]  }
   0x1 LB: > { %s1067_s13 = sadd.s32 4294967295, %s1166_s12   ;;  %p1071_p0 = scmp.ge.s32.totalorder %s1166_s12, 1  ;;  %s1166_s12 = sphi %s1197_s12, %s13_s12  }
   0x2   : > { %p137_p1 = scmp.lt.s32.totalorder %s1166_s12, 3 }
   0x4   : > { %p138_p2 = pnand %p1071_p0, %p137_p1 }
   0x5   : > { %p161_p3 = scmp.lt.s32.totalorder (!%p138_p2), %s1067_s13, 1  ;;  %s1168_s18 = smov (!%p138_p2), 127  }
   0x6   : > { %141 = sbr.rel (%p138_p2) target bundleno = 366 (0x16e), region = 32  ;;  %s1169_s19 = smov (!%p138_p2), 126  }
   0x7   : > { %s1170_s20 = smov (!%p138_p2), 110   ;;  %s1171_s21 = smov (!%p138_p2), 109  }
   0x8   : > { %s1172_s22 = smov (!%p138_p2), 108   ;;  %s1173_s23 = smov (!%p138_p2), 92  }
   0x9   : > { %s1174_s24 = smov (!%p138_p2), 91   ;;  %s1175_s25 = smov (!%p138_p2), 90  }
   0xb   : > { %s1353_s13 = smov (!%p161_p3, %s1067_s13), 1  ;;  %vm201_vm0 = vcmask 1043456   ;;  %vm197_vm1 = vcmask 31744   ;;  %v173_v38 = vld [vmem:[%s1348_s0] sm:$0xff]  ;;  %vm193_vm2 = vcmask 1039360   ;;  %vm360_vm3 = vcmask 1031168  }
   0xc   : > { %s1139_s14 = sshll.u32 %s1353_s13, 4  ;;  %v1075_v49 = vld [vmem:[%s1348_s0 + $0x8] sm:$0xff]  ;;  %vm453_vm4 = vcmask 900096   ;;  %v1088_v53 = vld [vmem:[%s1348_s0 + $0x10] sm:$0xff]  ;;  %v1095_v59 = vld [vmem:[%s1348_s0 + $0x18] sm:$0xff]  ;;  %vm546_vm5 = vcmask 891904  }
   0xd   : > { %s165_s17 = scalar_lea.vmem %s1350_s2, %s1139_s14  ;;  %vm639_vm6 = vcmask 883712   ;;  %vm732_vm7 = vcmask 752640   ;;  %vm825_vm8 = vcmask 744448   ;;  %vm918_vm9 = vcmask 736256  }
   0xe   : > { %v1211_v0 = vld [vmem:[%s165_s17 + $0x8] sm:$0xff]  ;;  %v1213_v1 = vld [vmem:[%s165_s17] sm:$0xff] }
   0xf   : > { %180 = vst [vmem:[#allocation1 + $0x10] ss:$2 sm:$0xff] %v1211_v0 }
  0x10   : > { %178 = vst [vmem:[#allocation1] ss:$2 sm:$0xff] %v1213_v1 }
  0x16   : > { %v183_v2 = vld.sshfl [vmem:[#allocation1 + $0x10] sm:$0xff pattern:$0x75316420]  ;;  %v184_v3 = vld.sshfl [vmem:[#allocation1 + $0x18] sm:$0xff pattern:$0x75316420] }
  0x17   : > { %189 = vrot.lane.b32.xlu0 %v183_v2, %s1168_s18  ;;  %v181_v4 = vld.sshfl [vmem:[#allocation1] sm:$0xff pattern:$0x75316420]  ;;  %270 = vst [vmem:[#allocation1 + $0x10] ss:$2 sm:$0xff] %v1211_v0 }
  0x18   : > { %185 = vrot.lane.b32.xlu1 %v181_v4, %s1168_s18  ;;  %v182_v5 = vld.sshfl [vmem:[#allocation1 + $0x8] sm:$0xff pattern:$0x75316420]  ;;  %v1102_v2 = vld [vmem:[%s1348_s0 + $0x20] sm:$0xff] }
  0x19   : > { %268 = vst [vmem:[#allocation1] ss:$2 sm:$0xff] %v1213_v1 }
  0x1e   : > { %v1219_v6 = vld.sshfl [vmem:[#allocation1 + $0x10] sm:$0xff pattern:$0x75316420] }
  0x1f   : > { %191 = vrot.lane.b32.xlu0 %v184_v3, %s1168_s18  ;;  %347 = vst [vmem:[#allocation1 + $0x10] ss:$2 sm:$0xff] %v1211_v0 }
  0x20   : > { %187 = vrot.lane.b32.xlu1 %v182_v5, %s1168_s18  ;;  %v1222_v7 = vld.sshfl [vmem:[#allocation1] sm:$0xff pattern:$0x75316420]  ;;  %v1224_v8 = vld.sshfl [vmem:[#allocation1 + $0x8] sm:$0xff pattern:$0x75316420] }
  0x21   : > { %345 = vst [vmem:[#allocation1] ss:$2 sm:$0xff] %v1213_v1  ;;  %1082 = vmatpush.msk.msra.mxu3 %vm201_vm0, %v1222_v7 }
  0x22   : > { %1083 = vmatmul.msk.f32.vlgmr.msra.gmra.mxu3 %vm197_vm1, %v173_v38 }
  0x26   : > { %v350_v9 = vld.sshfl [vmem:[#allocation1 + $0x10] sm:$0xff pattern:$0x75316420]  ;;  %v351_v10 = vld.sshfl [vmem:[#allocation1 + $0x18] sm:$0xff pattern:$0x75316420] }
  0x27   : > { %356 = vrot.lane.b32.xlu0 %v350_v9, %s1169_s19  ;;  %440 = vst [vmem:[#allocation1 + $0x10] ss:$2 sm:$0xff] %v1211_v0 }
  0x28   : > { %v348_v11 = vld.sshfl [vmem:[#allocation1] sm:$0xff pattern:$0x75316420]  ;;  %v349_v12 = vld.sshfl [vmem:[#allocation1 + $0x8] sm:$0xff pattern:$0x75316420] }
  0x29   : > { %352 = vrot.lane.b32.xlu2 %v348_v11, %s1169_s19  ;;  %438 = vst [vmem:[#allocation1] ss:$2 sm:$0xff] %v1213_v1 }
  0x2e   : > { %v443_v13 = vld.sshfl [vmem:[#allocation1 + $0x10] sm:$0xff pattern:$0x75316420]  ;;  %v444_v14 = vld.sshfl [vmem:[#allocation1 + $0x18] sm:$0xff pattern:$0x75316420] }
  0x2f   : > { %358 = vrot.lane.b32.xlu0 %v351_v10, %s1169_s19  ;;  %533 = vst [vmem:[#allocation1 + $0x10] ss:$2 sm:$0xff] %v1211_v0  ;;  %v1109_v10 = vld [vmem:[%s1348_s0 + $0x28] sm:$0xff] }
  0x30   : > { %v442_v15 = vld.sshfl [vmem:[#allocation1 + $0x8] sm:$0xff pattern:$0x75316420]  ;;  %v441_v16 = vld.sshfl [vmem:[#allocation1] sm:$0xff pattern:$0x75316420] }
  0x31   : > { %447 = vrot.lane.b32.xlu1 %v442_v15, %s1170_s20  ;;  %354 = vrot.lane.b32.xlu2 %v349_v12, %s1169_s19  ;;  %531 = vst [vmem:[#allocation1] ss:$2 sm:$0xff] %v1213_v1 }
  0x36   : > { %v536_v17 = vld.sshfl [vmem:[#allocation1 + $0x10] sm:$0xff pattern:$0x75316420]  ;;  %v537_v18 = vld.sshfl [vmem:[#allocation1 + $0x18] sm:$0xff pattern:$0x75316420] }
  0x37   : > { %542 = vrot.lane.b32.xlu0 %v536_v17, %s1171_s21  ;;  %626 = vst [vmem:[#allocation1 + $0x10] ss:$2 sm:$0xff] %v1211_v0  ;;  %v1116_v17 = vld [vmem:[%s1348_s0 + $0x30] sm:$0xff] }
  0x38   : > { %v534_v19 = vld.sshfl [vmem:[#allocation1] sm:$0xff pattern:$0x75316420]  ;;  %v535_v20 = vld.sshfl [vmem:[#allocation1 + $0x8] sm:$0xff pattern:$0x75316420] }
  0x39   : > { %445 = vrot.lane.b32.xlu1 %v441_v16, %s1170_s20  ;;  %449 = vrot.lane.b32.xlu2 %v443_v13, %s1170_s20  ;;  %624 = vst [vmem:[#allocation1] ss:$2 sm:$0xff] %v1213_v1 }
  0x3e   : > { %v629_v21 = vld.sshfl [vmem:[#allocation1 + $0x10] sm:$0xff pattern:$0x75316420]  ;;  %v630_v22 = vld.sshfl [vmem:[#allocation1 + $0x18] sm:$0xff pattern:$0x75316420] }
  0x3f   : > { %540 = vrot.lane.b32.xlu0 %v535_v20, %s1171_s21  ;;  %719 = vst [vmem:[#allocation1 + $0x10] ss:$2 sm:$0xff] %v1211_v0 }
  0x40   : > { %v627_v23 = vld.sshfl [vmem:[#allocation1] sm:$0xff pattern:$0x75316420]  ;;  %v628_v24 = vld.sshfl [vmem:[#allocation1 + $0x8] sm:$0xff pattern:$0x75316420] }
  0x41   : > { %544 = vrot.lane.b32.xlu1 %v537_v18, %s1171_s21  ;;  %451 = vrot.lane.b32.xlu2 %v444_v14, %s1170_s20  ;;  %717 = vst [vmem:[#allocation1] ss:$2 sm:$0xff] %v1213_v1 }
  0x46   : > { %v722_v25 = vld.sshfl [vmem:[#allocation1 + $0x10] sm:$0xff pattern:$0x75316420]  ;;  %v723_v26 = vld.sshfl [vmem:[#allocation1 + $0x18] sm:$0xff pattern:$0x75316420] }
  0x47   : > { %637 = vrot.lane.b32.xlu0 %v630_v22, %s1172_s22  ;;  %812 = vst [vmem:[#allocation1 + $0x10] ss:$2 sm:$0xff] %v1211_v0  ;;  %v994_v22 = vld [vmem:[%s1349_s1] sm:$0xff] }
  0x48   : > { %v721_v27 = vld.sshfl [vmem:[#allocation1 + $0x8] sm:$0xff pattern:$0x75316420]  ;;  %v720_v28 = vld.sshfl [vmem:[#allocation1] sm:$0xff pattern:$0x75316420] }
  0x49   : > { %631 = vrot.lane.b32.xlu1 %v627_v23, %s1172_s22  ;;  %538 = vrot.lane.b32.xlu2 %v534_v19, %s1171_s21  ;;  %810 = vst [vmem:[#allocation1] ss:$2 sm:$0xff] %v1213_v1  ;;  %v1123_v19 = vld [vmem:[%s1348_s0 + $0x38] sm:$0xff]  ;;  %v1176_v23 = vmov 0   ;;  %s1140_s21 = smul.u32 24, %s1353_s13 }
  0x4a   : > { %1158 = vset.pattern.permute.xlu2 %v1176_v23  ;;  %1159 = vset.pattern.permute.xlu0 %v1176_v23 }
  0x4e   : > { %v815_v29 = vld.sshfl [vmem:[#allocation1 + $0x10] sm:$0xff pattern:$0x75316420]  ;;  %v816_v30 = vld.sshfl [vmem:[#allocation1 + $0x18] sm:$0xff pattern:$0x75316420] }
  0x4f   : > { %724 = vrot.lane.b32.xlu0 %v720_v28, %s1173_s23  ;;  %905 = vst [vmem:[#allocation1 + $0x10] ss:$2 sm:$0xff] %v1211_v0 }
  0x50   : > { %v814_v31 = vld.sshfl [vmem:[#allocation1 + $0x8] sm:$0xff pattern:$0x75316420]  ;;  %v813_v32 = vld.sshfl [vmem:[#allocation1] sm:$0xff pattern:$0x75316420] }
  0x51   : > { %726 = vrot.lane.b32.xlu1 %v721_v27, %s1173_s23  ;;  %633 = vrot.lane.b32.xlu2 %v628_v24, %s1172_s22  ;;  %903 = vst [vmem:[#allocation1] ss:$2 sm:$0xff] %v1213_v1 }
  0x56   : > { %v908_v34 = vld.sshfl [vmem:[#allocation1 + $0x10] sm:$0xff pattern:$0x75316420]  ;;  %v909_v36 = vld.sshfl [vmem:[#allocation1 + $0x18] sm:$0xff pattern:$0x75316420] }
  0x57   : > { %821 = vrot.lane.b32.xlu0 %v815_v29, %s1174_s24 }
  0x58   : > { %v906_v33 = vld.sshfl [vmem:[#allocation1] sm:$0xff pattern:$0x75316420]  ;;  %v907_v35 = vld.sshfl [vmem:[#allocation1 + $0x8] sm:$0xff pattern:$0x75316420] }
  0x59   : > { %728 = vrot.lane.b32.xlu1 %v722_v25, %s1173_s23  ;;  %635 = vrot.lane.b32.xlu2 %v629_v21, %s1172_s22 }
  0x5f   : > { %823 = vrot.lane.b32.xlu0 %v816_v30, %s1174_s24 }
  0x61   : > { %730 = vrot.lane.b32.xlu1 %v723_v26, %s1173_s23  ;;  %819 = vrot.lane.b32.xlu2 %v814_v31, %s1174_s24 }
  0x67   : > { %910 = vrot.lane.b32.xlu0 %v906_v33, %s1175_s25 }
  0x69   : > { %914 = vrot.lane.b32.xlu1 %v908_v34, %s1175_s25  ;;  %817 = vrot.lane.b32.xlu2 %v813_v32, %s1174_s24  ;;  %v1130_v34 = vld [vmem:[%s1348_s0 + $0x40] sm:$0xff]  ;;  %s170_s24 = scalar_lea.vmem %s1351_s3, %s1140_s21 }
  0x71   : > { %912 = vrot.lane.b32.xlu1 %v907_v35, %s1175_s25  ;;  %916 = vrot.lane.b32.xlu2 %v909_v36, %s1175_s25 }
  0x79   : > { %997 = vperm.xlu2 %1158, %v994_v22  }
  0x83   : > { %v353_v37 = vpop.permute.xlu2 %352 }
  0x89   : > { %v190_v39 = vpop.permute.xlu0 %189 }
  0x8a   : > { %v186_v40 = vpop.permute.xlu1 %185 }
  0x8b   : > { %v355_v41 = vpop.permute.xlu2 %354 }
  0x8c   : > { %v361_v45 = vsel %vm360_vm3, %v353_v37, %v355_v41 }
  0x91   : > { %v192_v42 = vpop.permute.xlu0 %191 }
  0x92   : > { %v188_v43 = vpop.permute.xlu1 %187  ;;  %v196_v44 = vsel %vm193_vm2, %v190_v39, %v192_v42 }
  0x93   : > { %v194_v46 = vsel %vm193_vm2, %v186_v40, %v188_v43  ;;  %v195_v47 = vsel %vm193_vm2, %v188_v43, %v190_v39  ;;  %1080 = vmatpush.msk.msra.mxu2 %vm201_vm0, %v196_v44  ;;  %v450_v48 = vpop.permute.xlu2 %449 }
  0x94   : > { %1076 = vmatpush.msk.msra.mxu0 %vm201_vm0, %v194_v46  ;;  %1078 = vmatpush.msk.msra.mxu1 %vm201_vm0, %v195_v47 }
  0x95   : > { %1089 = vmatpush.msk.msrb.mxu2 %vm201_vm0, %v361_v45  ;;  %1077 = vmatmul.msk.f32.vlgmr.msra.gmra.mxu0 %vm197_vm1, %v1075_v49 }
  0x96   : > { %1084 = vmatpush.msk.msrb.mxu0 %vm201_vm0, %v1224_v8  ;;  %1079 = vmatmul.msk.f32.vlgmr.msra.gmra.mxu1 %vm197_vm1, %v1075_v49 }
  0x97   : > { %1081 = vmatmul.msk.f32.vlgmr.msra.gmra.mxu2 %vm197_vm1, %v1075_v49  ;;  %1086 = vmatpush.msk.msrb.mxu1 %vm201_vm0, %v1219_v6 }
  0x99   : > { %v357_v50 = vpop.permute.xlu0 %356 }
  0x9a   : > { %v362_v51 = vsel %vm360_vm3, %v355_v41, %v357_v50 }
  0x9b   : > { %1091 = vmatpush.msk.msrb.mxu3 %vm201_vm0, %v362_v51  ;;  %v452_v52 = vpop.permute.xlu2 %451 }
  0x9c   : > { %v456_v54 = vsel %vm453_vm4, %v450_v48, %v452_v52  ;;  %1092 = vmatmul.msk.f32.vlgmr.msrb.gmra.mxu3 %vm197_vm1, %v1088_v53 }
  0x9d   : > { %1100 = vmatpush.msk.msra.mxu3 %vm201_vm0, %v456_v54  ;;  %1085 = vmatmul.msk.f32.vlgmr.msrb.gmra.mxu0 %vm197_vm1, %v173_v38 }
  0x9e   : > { %1087 = vmatmul.msk.f32.vlgmr.msrb.gmra.mxu1 %vm197_vm1, %v173_v38 }
  0x9f   : > { %1090 = vmatmul.msk.f32.vlgmr.msrb.gmra.mxu2 %vm197_vm1, %v1088_v53 }
  0xa1   : > { %v359_v55 = vpop.permute.xlu0 %358 }
  0xa2   : > { %v363_v56 = vsel %vm360_vm3, %v357_v50, %v359_v55 }
  0xa3   : > { %v448_v57 = vpop.permute.xlu1 %447  ;;  %1093 = vmatpush.msk.msra.mxu0 %vm201_vm0, %v363_v56  ;;  %v539_v58 = vpop.permute.xlu2 %538 }
  0xa4   : > { %v455_v60 = vsel %vm453_vm4, %v448_v57, %v450_v48  ;;  %1101 = vmatmul.msk.f32.vlgmr.msra.gmra.mxu3 %vm197_vm1, %v1095_v59 }
  0xa5   : > { %1098 = vmatpush.msk.msra.mxu2 %vm201_vm0, %v455_v60  ;;  %1094 = vmatmul.msk.f32.vlgmr.msra.gmra.mxu0 %vm197_vm1, %v1088_v53  ;;  %v300_v43 = vpop.f32.mrf.mxu3 }
  0xa7   : > { %1099 = vmatmul.msk.f32.vlgmr.msra.gmra.mxu2 %vm197_vm1, %v1095_v59 }
  0xa9   : > { %v543_v61 = vpop.permute.xlu0 %542 }
  0xab   : > { %v446_v62 = vpop.permute.xlu1 %445  ;;  %v634_v63 = vpop.permute.xlu2 %633 }
  0xac   : > { %v454_v0 = vsel %vm453_vm4, %v446_v62, %v448_v57 }
  0xad   : > { %1096 = vmatpush.msk.msra.mxu1 %vm201_vm0, %v454_v0 }
  0xae   : > { %1097 = vmatmul.msk.f32.vlgmr.msra.gmra.mxu1 %vm197_vm1, %v1095_v59 }
  0xb1   : > { %v541_v1 = vpop.permute.xlu0 %540 }
  0xb2   : > { %v547_v3 = vsel %vm546_vm5, %v539_v58, %v541_v1  ;;  %v548_v4 = vsel %vm546_vm5, %v541_v1, %v543_v61 }
  0xb3   : > { %v545_v5 = vpop.permute.xlu1 %544  ;;  %1105 = vmatpush.msk.msrb.mxu1 %vm201_vm0, %v548_v4  ;;  %1103 = vmatpush.msk.msrb.mxu0 %vm201_vm0, %v547_v3  ;;  %v636_v6 = vpop.permute.xlu2 %635 }
  0xb4   : > { %v549_v7 = vsel %vm546_vm5, %v543_v61, %v545_v5  ;;  %v641_v8 = vsel %vm639_vm6, %v634_v63, %v636_v6  ;;  %1104 = vmatmul.msk.f32.vlgmr.msrb.gmra.mxu0 %vm197_vm1, %v1102_v2 }
  0xb5   : > { %1107 = vmatpush.msk.msrb.mxu2 %vm201_vm0, %v549_v7  ;;  %1112 = vmatpush.msk.msra.mxu0 %vm201_vm0, %v641_v8 }
  0xb6   : > { %1106 = vmatmul.msk.f32.vlgmr.msrb.gmra.mxu1 %vm197_vm1, %v1102_v2  ;;  %1108 = vmatmul.msk.f32.vlgmr.msrb.gmra.mxu2 %vm197_vm1, %v1102_v2 }
  0xb9   : > { %v638_v9 = vpop.permute.xlu0 %637 }
  0xba   : > { %v642_v11 = vsel %vm639_vm6, %v636_v6, %v638_v9 }
  0xbb   : > { %v632_v12 = vpop.permute.xlu1 %631  ;;  %v820_v13 = vpop.permute.xlu2 %819  ;;  %1114 = vmatpush.msk.msra.mxu1 %vm201_vm0, %v642_v11 }
  0xbc   : > { %v640_v14 = vsel %vm639_vm6, %v632_v12, %v634_v63  ;;  %1113 = vmatmul.msk.f32.vlgmr.msra.gmra.mxu0 %vm197_vm1, %v1109_v10 }
  0xbd   : > { %1110 = vmatpush.msk.msrb.mxu3 %vm201_vm0, %v640_v14 }
  0xbe   : > { %1111 = vmatmul.msk.f32.vlgmr.msrb.gmra.mxu3 %vm197_vm1, %v1109_v10  ;;  %1115 = vmatmul.msk.f32.vlgmr.msra.gmra.mxu1 %vm197_vm1, %v1109_v10 }
  0xc1   : > { %v725_v15 = vpop.permute.xlu0 %724 }
  0xc3   : > { %v727_v16 = vpop.permute.xlu1 %726  ;;  %v818_v18 = vpop.permute.xlu2 %817 }
  0xc4   : > { %v733_v20 = vsel %vm732_vm7, %v725_v15, %v727_v16  ;;  %v826_v21 = vsel %vm825_vm8, %v818_v18, %v820_v13 }
  0xc5   : > { %1117 = vmatpush.msk.msra.mxu2 %vm201_vm0, %v733_v20  ;;  %1124 = vmatpush.msk.msrb.mxu1 %vm201_vm0, %v826_v21 }
  0xc6   : > { %1118 = vmatmul.msk.f32.vlgmr.msra.gmra.mxu2 %vm197_vm1, %v1116_v17  ;;  %1125 = vmatmul.msk.f32.vlgmr.msrb.gmra.mxu1 %vm197_vm1, %v1123_v19 }
  0xc9   : > { %v822_v24 = vpop.permute.xlu0 %821 }
  0xca   : > { %v827_v25 = vsel %vm825_vm8, %v820_v13, %v822_v24 }
  0xcb   : > { %v729_v26 = vpop.permute.xlu1 %728  ;;  %1126 = vmatpush.msk.msrb.mxu2 %vm201_vm0, %v827_v25  ;;  %v917_v32 = vpop.permute.xlu2 %916 }
  0xcc   : > { %v734_v27 = vsel %vm732_vm7, %v727_v16, %v729_v26 }
  0xcd   : > { %1119 = vmatpush.msk.msra.mxu3 %vm201_vm0, %v734_v27 }
  0xce   : > { %1120 = vmatmul.msk.f32.vlgmr.msra.gmra.mxu3 %vm197_vm1, %v1116_v17  ;;  %1127 = vmatmul.msk.f32.vlgmr.msrb.gmra.mxu2 %vm197_vm1, %v1123_v19 }
  0xd1   : > { %v824_v28 = vpop.permute.xlu0 %823 }
  0xd2   : > { %v828_v29 = vsel %vm825_vm8, %v822_v24, %v824_v28 }
  0xd3   : > { %v731_v30 = vpop.permute.xlu1 %730  ;;  %1128 = vmatpush.msk.msrb.mxu3 %vm201_vm0, %v828_v29  ;;  %v998_v20 = vpop.permute.xlu2 %997 }
  0xd4   : > { %v735_v31 = vsel %vm732_vm7, %v729_v26, %v731_v30 }
  0xd5   : > { %1121 = vmatpush.msk.msrb.mxu0 %vm201_vm0, %v735_v31 }
  0xd6   : > { %1122 = vmatmul.msk.f32.vlgmr.msrb.gmra.mxu0 %vm197_vm1, %v1116_v17  ;;  %1129 = vmatmul.msk.f32.vlgmr.msrb.gmra.mxu3 %vm197_vm1, %v1123_v19 }
  0xd9   : > { %v911_v36 = vpop.permute.xlu0 %910 }
  0xdb   : > { %v915_v33 = vpop.permute.xlu1 %914 }
  0xdc   : > { %v921_v35 = vsel %vm918_vm9, %v915_v33, %v917_v32 }
  0xdd   : > { %1135 = vmatpush.msk.msra.mxu2 %vm201_vm0, %v921_v35 }
  0xde   : > { %1136 = vmatmul.msk.f32.vlgmr.msra.gmra.mxu2 %vm197_vm1, %v1130_v34 }
  0xe3   : > { %v913_v37 = vpop.permute.xlu1 %912 }
  0xe4   : > { %v920_v38 = vsel %vm918_vm9, %v913_v37, %v915_v33  ;;  %v919_v39 = vsel %vm918_vm9, %v911_v36, %v913_v37 }
  0xe5   : > { %1131 = vmatpush.msk.msra.mxu0 %vm201_vm0, %v919_v39  ;;  %1133 = vmatpush.msk.msra.mxu1 %vm201_vm0, %v920_v38 }
  0xe6   : > { %1132 = vmatmul.msk.f32.vlgmr.msra.gmra.mxu0 %vm197_vm1, %v1130_v34  ;;  %1134 = vmatmul.msk.f32.vlgmr.msra.gmra.mxu1 %vm197_vm1, %v1130_v34 }
 0x112   : > { %v225_v40 = vpop.f32.mrf.mxu0 }
 0x113   : > { %v245_v41 = vpop.f32.mrf.mxu1  ;;  %v301_v58 = vadd.f32 %v300_v43, %v225_v40 }
 0x11a   : > { %v265_v42 = vpop.f32.mrf.mxu2  ;;  %v320_v44 = vpop.f32.mrf.mxu0 }
 0x11b   : > { %v340_v45 = vpop.f32.mrf.mxu1  ;;  %v321_v56 = vadd.f32 %v320_v44, %v245_v41 }
 0x11c   : > { %v341_v57 = vadd.f32 %v340_v45, %v265_v42 }
 0x11f   : > { %v410_v47 = vpop.f32.mrf.mxu3 }
 0x120   : > { %v434_v59 = vadd.f32 %v410_v47, %v321_v56 }
 0x122   : > { %v390_v46 = vpop.f32.mrf.mxu2  ;;  %v430_v48 = vpop.f32.mrf.mxu0 }
 0x123   : > { %v435_v60 = vadd.f32 %v430_v48, %v341_v57  ;;  %v433_v62 = vadd.f32 %v390_v46, %v301_v58 }
 0x127   : > { %v523_v51 = vpop.f32.mrf.mxu3 }
 0x128   : > { %v528_v3 = vadd.f32 %v523_v51, %v435_v60 }
 0x12a   : > { %v503_v50 = vpop.f32.mrf.mxu2 }
 0x12b   : > { %v483_v49 = vpop.f32.mrf.mxu1  ;;  %v527_v2 = vadd.f32 %v503_v50, %v434_v59 }
 0x12c   : > { %v526_v4 = vadd.f32 %v483_v49, %v433_v62 }
 0x131   : > { %v576_v52 = vpop.f32.mrf.mxu0 }
 0x132   : > { %v619_v8 = vadd.f32 %v576_v52, %v526_v4 }
 0x133   : > { %v596_v53 = vpop.f32.mrf.mxu1 }
 0x134   : > { %v620_v5 = vadd.f32 %v596_v53, %v527_v2 }
 0x139   : > { %v616_v54 = vpop.f32.mrf.mxu2  ;;  %v689_v63 = vpop.f32.mrf.mxu0 }
 0x13a   : > { %v621_v6 = vadd.f32 %v616_v54, %v528_v3  ;;  %v713_v12 = vadd.f32 %v689_v63, %v620_v5 }
 0x13b   : > { %v709_v0 = vpop.f32.mrf.mxu1 }
 0x13c   : > { %v714_v13 = vadd.f32 %v709_v0, %v621_v6 }
 0x141   : > { %v669_v55 = vpop.f32.mrf.mxu3 }
 0x142   : > { %v712_v11 = vadd.f32 %v669_v55, %v619_v8 }
 0x143   : > { %v855_v9 = vpop.f32.mrf.mxu1 }
 0x149   : > { %v762_v61 = vpop.f32.mrf.mxu2 }
 0x14a   : > { %v805_v15 = vadd.f32 %v762_v61, %v712_v11 }
 0x14c   : > { %v898_v21 = vadd.f32 %v855_v9, %v805_v15 }
 0x151   : > { %v782_v1 = vpop.f32.mrf.mxu3  ;;  %v875_v7 = vpop.f32.mrf.mxu2 }
 0x152   : > { %v806_v16 = vadd.f32 %v782_v1, %v713_v12 }
 0x153   : > { %v802_v10 = vpop.f32.mrf.mxu0 }
 0x154   : > { %v807_v17 = vadd.f32 %v802_v10, %v714_v13  ;;  %v899_v22 = vadd.f32 %v875_v7, %v806_v16 }
 0x159   : > { %v895_v14 = vpop.f32.mrf.mxu3 }
 0x15a   : > { %v900_v18 = vadd.f32 %v895_v14, %v807_v17 }
 0x161   : > { %v988_v19 = vpop.f32.mrf.mxu2 }
 0x162   : > { %v993_v23 = vadd.f32 %v988_v19, %v900_v18 }
 0x163   : > { %v948_v24 = vpop.f32.mrf.mxu0  ;;  %v968_v25 = vpop.f32.mrf.mxu1 }
 0x164   : > { %v1002_v26 = vadd.f32 %v998_v20, %v993_v23  ;;  %v991_v27 = vadd.f32 %v948_v24, %v898_v21  ;;  %v992_v28 = vadd.f32 %v968_v25, %v899_v22 }
 0x166   : > { %v1005_v29 = vmul.f32 0.1, %v1002_v26  ;;  %v1000_v30 = vadd.f32 %v998_v20, %v991_v27  ;;  %v1001_v31 = vadd.f32 %v998_v20, %v992_v28 }
 0x168   : > { %v1008_v32 = vmax.f32 %v1002_v26, %v1005_v29  ;;  %v1003_v33 = vmul.f32 0.1, %v1000_v30  ;;  %v1004_v34 = vmul.f32 0.1, %v1001_v31 }
 0x16a   : > { %1011 = vst [vmem:[%s170_s24 + $0x10] sm:$0xff] %v1008_v32  ;;  %v1006_v35 = vmax.f32 %v1000_v30, %v1003_v33  ;;  %v1007_v36 = vmax.f32 %v1001_v31, %v1004_v34 }
 0x16c   : > { %1009 = vst [vmem:[%s170_s24] sm:$0xff] %v1006_v35 }
 0x16d   : > { %1010 = vst [vmem:[%s170_s24 + $0x8] sm:$0xff] %v1007_v36 }
 0x16e PF: > { %s13_s12 = sadd.s32 1, %s1166_s12  }
 0x16f   : > { %p10_p4 = scmp.ge.s32.totalorder %s13_s12, 4  }
 0x171   :  { %12 = sbr.rel (!%p10_p4) target bundleno = 1 (0x1), region = 79 }

</bundles_post_ra>
